<compile_context>
chip_gen: v7x
topology: tpu7x:2x2x1
jax: 0.10.0
libtpu: 0.0.40
codegen_flags: <defaults>
</compile_context>

<pallas_src>
import functools

import jax
import jax.numpy as jnp
from jax.experimental import pallas as pl
from jax.experimental.pallas import tpu as pltpu

_LANE = 128


def _identity_value(dtype):
    dtype = jnp.dtype(dtype)
    if jnp.issubdtype(dtype, jnp.floating):
        return float("-inf")
    if jnp.issubdtype(dtype, jnp.integer):
        return int(jnp.iinfo(dtype).min)
    raise ValueError(f"unsupported dtype for max pooling: {dtype}")


def _sublane(itemsize):
    return {4: 8, 2: 16, 1: 32}.get(itemsize, 8)


def _round_up(x, m):
    return -(-x // m) * m


def _round_down(x, m):
    return (x // m) * m


def _tensorcores_per_chip():
    # Only multi-TensorCore chips (v7x, and megacore v4/v5p) benefit from
    # forcing >= 2 parallel grid steps; on v5e/v6e (1 TC) capping the bag tile
    # just shrinks tiles for nothing.
    try:
        kind = (getattr(jax.devices()[0], "device_kind", "") or "").lower()
    except Exception:
        return 1
    return 2 if any(t in kind for t in ("v7", "v5p", "v4")) else 1


# ---------------------------------------------------------------------------
# Kernels
# ---------------------------------------------------------------------------
def _max_pool_single_kernel(x_ref, o_ref):
    # x_ref: (tb, N, td) -- whole instance axis resident; o_ref: (tb, td)
    o_ref[...] = jnp.max(x_ref[...], axis=1)


def _max_pool_tiled_kernel(x_ref, o_ref, *, init, n_total, tn, needs_mask):
    # x_ref: (tb, tn, td); o_ref: (tb, td) accumulator, resident across grid
    # axis 2 (the reduction axis, last in the grid).
    n_idx = pl.program_id(2)

    @pl.when(n_idx == 0)
    def _():
        o_ref[...] = jnp.full(o_ref.shape, init, dtype=o_ref.dtype)

    x = x_ref[...]
    if needs_mask:
        # Partial last N block: out-of-range rows contain garbage; replace
        # them with the max identity.  A few VPU ops, hidden under the DMA.
        row = jax.lax.broadcasted_iota(jnp.int32, x.shape, 1) + n_idx * tn
        x = jnp.where(row < n_total, x, jnp.asarray(init, dtype=x.dtype))
    o_ref[...] = jnp.maximum(o_ref[...], jnp.max(x, axis=1))


# ---------------------------------------------------------------------------
# Wrapper
# ---------------------------------------------------------------------------
def max_pooling(feats, *, input_buffer_bytes=4 * 1024 * 1024):
    """torch.max(feats, dim=1)[0]:  (B, N, D) -> (B, D)."""
    B, N, D = feats.shape
    dtype = feats.dtype
    itemsize = jnp.dtype(dtype).itemsize
    sub = _sublane(itemsize)
    ident = _identity_value(dtype)
    cores = _tensorcores_per_chip()

    # ---- D (lane) tiling: only when one sublane group of full-D rows would
    #      blow the per-buffer budget (very wide feature dims). --------------
    d_pad = _round_up(D, _LANE)
    if D <= _LANE or sub * d_pad * itemsize <= input_buffer_bytes:
        td, nb_d, td_pad = D, 1, d_pad            # full-D block (== array dim)
    else:
        td = max(_LANE, _round_down(input_buffer_bytes // (sub * itemsize), _LANE))
        nb_d, td_pad = pl.cdiv(D, td), td         # 128-multiple D tile

    # Rows of width td that fit the per-buffer VMEM budget (double-buffered by
    # the default Buffered(2) pipeline; 2 x 4 MiB fits every scoped default).
    rows_budget = max(sub, input_buffer_bytes // (td_pad * itemsize))
    n_pad = _round_up(N, sub)

    if n_pad <= rows_budget:
        # ---- whole instance axis resident: no reduction grid axis ----------
        tb = min(B, rows_budget // n_pad)
        if tb >= 8:
            tb = _round_down(tb, 8)               # sublane-aligned output store
        if cores >= 2 and nb_d == 1 and B >= 2:
            tb = min(tb, pl.cdiv(B, 2))           # feed both TensorCores (v7x)
        tb = max(tb, 1)
        out = pl.pallas_call(
            _max_pool_single_kernel,
            out_shape=jax.ShapeDtypeStruct((B, D), dtype),
            grid_spec=pltpu.PrefetchScalarGridSpec(
                num_scalar_prefetch=0,
                grid=(pl.cdiv(B, tb), nb_d),
                in_specs=[pl.BlockSpec((tb, N, td), lambda b, d: (b, 0, d))],
                out_specs=pl.BlockSpec((tb, td), lambda b, d: (b, d)),
            ),
            compiler_params=pltpu.CompilerParams(
                dimension_semantics=("parallel", "parallel")),
        )(feats)
    else:
        # ---- tile the instance axis; output block is the accumulator -------
        tb = min(B, 8)                            # sublane-aligned accumulator
        if tb * sub > rows_budget:
            tb = max(1, rows_budget // sub)
        if cores >= 2 and nb_d == 1 and B >= 2:
            tb = min(tb, pl.cdiv(B, 2))
        tb = max(tb, 1)
        tn = max(sub, _round_down(rows_budget // tb, sub))
        needs_mask = (N % tn) != 0
        kernel = functools.partial(_max_pool_tiled_kernel, init=ident,
                                   n_total=N, tn=tn, needs_mask=needs_mask)
        out = pl.pallas_call(
            kernel,
            out_shape=jax.ShapeDtypeStruct((B, D), dtype),
            grid_spec=pltpu.PrefetchScalarGridSpec(
                num_scalar_prefetch=0,
                grid=(pl.cdiv(B, tb), nb_d, pl.cdiv(N, tn)),
                in_specs=[pl.BlockSpec((tb, tn, td), lambda b, d, n: (b, n, d))],
                out_specs=pl.BlockSpec((tb, td), lambda b, d, n: (b, d)),
            ),
            compiler_params=pltpu.CompilerParams(
                dimension_semantics=("parallel", "parallel", "arbitrary")),
        )(feats)

    return out


if __name__ == "__main__":
    key = jax.random.PRNGKey(0)
    k1, k2, k3, k4 = jax.random.split(key, 4)

    # Case 1: small shapes consistent with the module -- single-tile path
    # (whole instance axis resident, no reduction grid axis).
    B, N, D = 2, 8, 32
    feats = jax.random.normal(k1, (B, N, D), dtype=jnp.float32)
    out = jax.block_until_ready(max_pooling(feats))
    ref = jnp.max(feats, axis=1)
    assert out.shape == (B, D)
    assert jnp.allclose(out, ref), "mismatch (single-tile path)"

    # Case 2: tiny VMEM budget forces the instance-tiled accumulator path.
    B2, N2, D2 = 2, 64, 32
    feats2 = jax.random.normal(k2, (B2, N2, D2), dtype=jnp.float32)
    out2 = jax.block_until_ready(max_pooling(feats2, input_buffer_bytes=4096))
    ref2 = jnp.max(feats2, axis=1)
    assert out2.shape == (B2, D2)
    assert jnp.allclose(out2, ref2), "mismatch (tiled path)"

    # Case 3: awkward shapes -- exercises D tiling, partial N block masking,
    # and partial bag edge blocks (no wrapper-side padding anywhere).
    B3, N3, D3 = 3, 37, 200
    feats3 = jax.random.normal(k3, (B3, N3, D3), dtype=jnp.float32)
    out3 = jax.block_until_ready(max_pooling(feats3, input_buffer_bytes=4096))
    ref3 = jnp.max(feats3, axis=1)
    assert out3.shape == (B3, D3)
    assert jnp.allclose(out3, ref3), "mismatch (D-tiled / masked path)"

    # Case 4: bag axis not divisible by the bag tile (cdiv edge block on B).
    B4, N4, D4 = 10, 16, 32
    feats4 = jax.random.normal(k4, (B4, N4, D4), dtype=jnp.float32)
    out4 = jax.block_until_ready(max_pooling(feats4, input_buffer_bytes=24576))
    ref4 = jnp.max(feats4, axis=1)
    assert out4.shape == (B4, D4)
    assert jnp.allclose(out4, ref4), "mismatch (partial bag block path)"

    print("KERNEL_OK")
</pallas_src>

<mosaic_0001>
module attributes {stable_mosaic.version = 11 : i64} {
  func.func @_max_pool_single_kernel(%arg0: i32, %arg1: i32, %arg2: memref<2x8x32xf32, #tpu.memory_space<vmem>>, %arg3: memref<2x32xf32, #tpu.memory_space<vmem>>) attributes {dimension_semantics = [#tpu.dimension_semantics<parallel>, #tpu.dimension_semantics<parallel>], iteration_bounds = array<i64: 1, 1>, scalar_prefetch = 0 : i64, scratch_operands = 0 : i64, tpu.core_type = #tpu.core_type<tc>, window_params = [{transform_indices = @transform_0, window_bounds = array<i64: 2, 8, 32>}, {transform_indices = @transform_1, window_bounds = array<i64: 2, 32>}]} {
    %c0 = arith.constant 0 : index
    %c0_0 = arith.constant 0 : index
    %c0_1 = arith.constant 0 : index
    %0 = vector.load %arg2[%c0, %c0_0, %c0_1] : memref<2x8x32xf32, #tpu.memory_space<vmem>>, vector<2x8x32xf32>
    %cst = arith.constant dense<0xFF800000> : vector<2x32xf32>
    %1 = vector.multi_reduction <maximumf>, %0, %cst [1] : vector<2x8x32xf32> to vector<2x32xf32>
    %c0_2 = arith.constant 0 : index
    %c0_3 = arith.constant 0 : index
    %2 = vector.load %arg3[%c0_2, %c0_3] : memref<2x32xf32, #tpu.memory_space<vmem>>, vector<2x32xf32>
    tpu.vector_store %arg3[%c0_2, %c0_3], %1 {strides = array<i32>} : memref<2x32xf32, #tpu.memory_space<vmem>>, vector<2x32xf32>,
    return
  }
  func.func @transform_0(%arg0: i32, %arg1: i32) -> (i32, i32, i32) {
    %c0_i32 = arith.constant 0 : i32
    %c0_i32_0 = arith.constant 0 : i32
    return %arg0, %c0_i32, %arg1 : i32, i32, i32
  }
  func.func @transform_1(%arg0: i32, %arg1: i32) -> (i32, i32) {
    %c0_i32 = arith.constant 0 : i32
    return %arg0, %arg1 : i32, i32
  }
}

</mosaic_0001>

<bundles_post_ra>
// kernel: tpu_custom_call.1
= control target key start
LH: loop header
LB: loop body
LE: loop exit
PB: predicated region body
PF: predicated region fallthrough
CT: control target
= control target key end

     0   :  { %6 = vsyncpa [#allocation3], 0  ;;  %s152_s0 = inlined_call_operand.hbm [shape: f32[2,8,32], index: 0, kind: input, shape index: {}]   ;;  %s153_s1 = inlined_call_operand.hbm [shape: f32[2,32], index: 1, kind: output, shape index: {}]  }
   0x1   :  { %7 = vsyncpa [#allocation4], 0  ;;  %s114_s6 = smov [#allocation2]   ;;  %s66_s10 = scalar_lea.hbm %s152_s0, 256 }
   0x2   :  { %s13_s7 = sshll.u32 %s114_s6, 4  ;;  %p67_p0 = scmp.ne.s32.totalorder %s152_s0, %s66_s10  ;;  %s14_s7 = int_to_ptr.vmem [resolvable:$true] %s13_s7 }
   0x3   :  { %p70_p1 = scmp.lt.u32.totalorder %s66_s10, %s152_s0 }
   0x5   :  { %p72_p2 = pnand %p70_p1, %p67_p0 }
   0x7   :  { %75 = shalt.err (!%p72_p2)
}
   0x8   :  { %s76_s15 = scalar_lea.vmem %s14_s7, 256  ;;  %p81_p4 = scmp.lt.s32.totalorder %s14_s7, %s14_s7 }
   0x9   :  { %p77_p3 = scmp.ne.s32.totalorder %s14_s7, %s76_s15  ;;  %p82_p5 = scmp.lt.s32.totalorder %s76_s15, %s76_s15 }
   0xb   :  { %p83_p6 = por %p82_p5, %p81_p4 }
   0xd   :  { %p84_p7 = pnand %p83_p6, %p77_p3 }
   0xf   :  { %87 = shalt.err (!%p84_p7)
}
  0x10   :  { %s115_s16 = smov 128   ;;  %s116_s17 = smov 8  }
  0x11   :  { %19 = dma.hbm_to_vmem [thread:$0]  %s152_s0, 256, %s14_s7, [#allocation3], %s115_s16, %s115_s16, %s116_s17  }
  0x12   :  { %110 = dma.done.wait [#allocation3], 256  }
  0x13   :  { %111 = vsyncadd [#allocation3], 4294967040  ;;  %vm25_vm0 = vcmask 261120   ;;  %v23_v0 = vld [vmem:[#allocation2] sm:$0xff]  ;;  %v24_v1 = vld [vmem:[#allocation2 + $0x8] sm:$0xff]  ;;  %s117_s20 = smov [#allocation5]  }
  0x14   :  { %v26_v2 = vsel %vm25_vm0, %v23_v0, -inf  ;;  %v33_v3 = vsel %vm25_vm0, %v24_v1, -inf  ;;  %s53_s21 = sshll.u32 %s117_s20, 4  ;;  %vm42_vm1 = vcmask 1041409   ;;  %vm45_vm2 = vcmask 254976   ;;  %s54_s21 = int_to_ptr.vmem [resolvable:$true] %s53_s21 }
  0x15   :  { %v27_v4 = vrot.slane %v26_v2, 4  ;;  %v34_v5 = vrot.slane %v33_v3, 4  ;;  %s88_s0 = scalar_lea.vmem %s54_s21, 32  ;;  %p93_p9 = scmp.lt.s32.totalorder %s54_s21, %s54_s21 }
  0x16   :  { %p89_p8 = scmp.ne.s32.totalorder %s54_s21, %s88_s0  ;;  %p94_p10 = scmp.lt.s32.totalorder %s88_s0, %s88_s0 }
  0x17   :  { %v28_v6 = vmax.f32 %v26_v2, %v27_v4  ;;  %v35_v7 = vmax.f32 %v33_v3, %v34_v5 }
  0x18   :  { %p95_p11 = por %p94_p10, %p93_p9 }
  0x19   :  { %v29_v8 = vrot.slane %v28_v6, 2  ;;  %v36_v9 = vrot.slane %v35_v7, 2 }
  0x1a   :  { %p96_p12 = pnand %p95_p11, %p89_p8 }
  0x1b   :  { %v30_v10 = vmax.f32 %v28_v6, %v29_v8  ;;  %v37_v11 = vmax.f32 %v35_v7, %v36_v9 }
  0x1d   :  { %v31_v12 = vrot.slane %v30_v10, 1  ;;  %v38_v13 = vrot.slane %v37_v11, 1 }
  0x1f   :  { %v32_v14 = vmax.f32 %v30_v10, %v31_v12  ;;  %v39_v15 = vmax.f32 %v37_v11, %v38_v13 }
  0x21   :  { %v43_v16 = vsel %vm42_vm1, %v39_v15, %v32_v14 }
  0x22   :  { %46 = vst.msk [vmem:[#allocation5] sm:$0x3] %vm45_vm2, %v43_v16 }
  0x23   :  { %99 = shalt.err (!%p96_p12)
}
  0x24   :  { %s100_s24 = scalar_lea.hbm %s153_s1, 32 }
  0x25   :  { %p101_p13 = scmp.ne.s32.totalorder %s153_s1, %s100_s24  ;;  %p104_p0 = scmp.lt.u32.totalorder %s100_s24, %s153_s1 }
  0x27   :  { %p106_p1 = pnand %p104_p0, %p101_p13 }
  0x29   :  { %109 = shalt.err (!%p106_p1)
}
  0x2a   :  { %56 = dma.vmem_to_hbm [thread:$0]  %s54_s21, 32, %s153_s1, [#allocation4]  }
  0x2b   :  { %112 = dma.done.wait [#allocation4], 32  }
  0x2c   :  { %113 = vsyncadd [#allocation4], 4294967264 }
  0x2d   :  { %60 = vsyncpa [#allocation3], 1 }
  0x2e   :  { %61 = vsyncpa [#allocation4], 1 }

</bundles_post_ra>
